<compile_context>
chip_gen: v6e
topology: v6e:2x2x1
jax: 0.10.0
libtpu: 0.0.40
codegen_flags: <defaults>
</compile_context>

<pallas_src>
import jax
import jax.numpy as jnp
from jax.experimental import pallas as pl
from jax.experimental.pallas import tpu as pltpu


def _round_up(x: int, m: int) -> int:
    return (x + m - 1) // m * m


# ---------------------------------------------------------------------------
# Fused kernel: logits_tile = x_tile @ W' + b'   (normalization pre-folded)
#   x_ref: (tm, D)      bf16 (streamed, pipelined over the batch grid)
#   w_ref: (D, K_pad)   bf16 (VMEM-resident across the grid)
#   b_ref: (1, K_pad)   f32  (VMEM-resident across the grid)
#   o_ref: (tm, K_pad)  f32  (lane-dense output tile)
# ---------------------------------------------------------------------------
def _linear_kernel(x_ref, w_ref, b_ref, o_ref):
    o_ref[...] = (
        jnp.dot(x_ref[...], w_ref[...], preferred_element_type=jnp.float32)  # MXU
        + b_ref[...]
    )


# ---------------------------------------------------------------------------
# One-time parameter prep (hoist out of the per-call path):
#   fold (x - mean)/std into W/b, pad classes to a 128-lane boundary,
#   cast W' to the streaming dtype (bias stays f32).
# ---------------------------------------------------------------------------
def prepare_net_params(mean_c, std_c, w, b, *, hw, stream_dtype=jnp.bfloat16):
    D, K = w.shape
    w32 = w.astype(jnp.float32)
    b32 = jnp.asarray(b, jnp.float32).reshape(1, K)

    # Per-feature expansion matching the (N, C, H, W) -> (N, C*H*W) flatten.
    inv_std_row = jnp.repeat(1.0 / std_c.astype(jnp.float32), hw)          # (D,)
    mean_row = jnp.repeat(mean_c.astype(jnp.float32), hw)                  # (D,)

    w_fold = inv_std_row[:, None] * w32                                    # (D, K)
    b_fold = b32 - (mean_row * inv_std_row)[None, :] @ w32                 # (1, K)

    K_pad = max(_round_up(K, 128), 128)  # lane-dense output stores
    w_pad = (
        jnp.zeros((D, K_pad), stream_dtype).at[:, :K].set(w_fold.astype(stream_dtype))
    )
    b_pad = jnp.zeros((1, K_pad), jnp.float32).at[:, :K].set(b_fold)
    return w_pad, b_pad


# ---------------------------------------------------------------------------
# Net forward: normalization (folded) + stand-in classifier head, one kernel.
# ---------------------------------------------------------------------------
def net_forward(x_nchw, w_pad, b_pad, *, num_classes, tile_m=512):
    N, C, H, W = x_nchw.shape
    D = C * H * W
    K_pad = w_pad.shape[1]
    assert w_pad.shape[0] == D and b_pad.shape == (1, K_pad)

    # Flatten (metadata only) and stream x in the same narrow dtype as W'.
    # (D = 768 here is already a multiple of 128; a non-aligned D is still
    # legal because the block spans the full D extent.)
    x2d = x_nchw.reshape(N, D).astype(w_pad.dtype)

    # Row tile: multiple of 8 sublanes (or == N for tiny batches). No jnp.pad
    # of x -- Pallas masks the ragged last block. For medium batches shrink
    # the tile so the grid has >=2 steps (v7x megacore via "parallel").
    if N <= 8:
        tm = N
    else:
        tm = min(tile_m, _round_up(pl.cdiv(N, 2), 8))
    grid = (pl.cdiv(N, tm),)

    # Conservative VMEM budget (v7x: 64 MiB physical / 32 MiB scoped default):
    # double-buffered x + out, W'/b' resident (worst case double-buffered).
    isz = jnp.dtype(w_pad.dtype).itemsize
    vmem_est = (
        2 * tm * D * isz          # x tiles (double-buffered)
        + 2 * D * K_pad * isz     # W'
        + 2 * K_pad * 4           # b'
        + 2 * tm * K_pad * 4      # out tiles (double-buffered, f32)
    )
    vmem_limit = max(16 << 20, min(32 << 20, int(2 * vmem_est)))

    def call(single_buffer_consts):
        const_kw = (
            {"pipeline_mode": pl.Buffered(buffer_count=1)}
            if single_buffer_consts
            else {}
        )
        return pl.pallas_call(
            _linear_kernel,
            out_shape=jax.ShapeDtypeStruct((N, K_pad), jnp.float32),
            grid_spec=pltpu.PrefetchScalarGridSpec(
                num_scalar_prefetch=0,
                grid=grid,
                in_specs=[
                    pl.BlockSpec((tm, D), lambda i: (i, 0)),                  # x
                    pl.BlockSpec((D, K_pad), lambda i: (0, 0), **const_kw),   # W'
                    pl.BlockSpec((1, K_pad), lambda i: (0, 0), **const_kw),   # b'
                ],
                out_specs=pl.BlockSpec((tm, K_pad), lambda i: (i, 0)),
            ),
            compiler_params=pltpu.CompilerParams(
                dimension_semantics=("parallel",),   # batch axis -> both TCs on v7x
                vmem_limit_bytes=vmem_limit,
            ),
        )(x2d, w_pad, b_pad)

    try:
        out = call(single_buffer_consts=True)    # W'/b' not double-buffered
    except Exception:                            # pl.Buffered(1) unsupported
        out = call(single_buffer_consts=False)

    # Slice away class-lane padding (tiny N x 128 -> N x K copy).
    return out[:, :num_classes]


if __name__ == "__main__":
    # Small shapes: batch=2, 3 channels (cifar10 normalization), 16x16 spatial.
    N, C, H, W = 2, 3, 16, 16
    NUM_CLASSES = 10

    key = jax.random.PRNGKey(0)
    kx, kw, kb = jax.random.split(key, 3)

    x = jax.random.uniform(kx, (N, C, H, W), dtype=jnp.float32)

    # cifar10 normalization constants from the module's __init__.
    mean_c = jnp.array([0.5, 0.5, 0.5], dtype=jnp.float32)
    std_c = jnp.array([0.5, 0.5, 0.5], dtype=jnp.float32)

    # Deterministic stand-in classifier weights.
    D = C * H * W
    w = jax.random.normal(kw, (D, NUM_CLASSES), dtype=jnp.float32) * 0.02
    b = jax.random.normal(kb, (1, NUM_CLASSES), dtype=jnp.float32) * 0.01

    # One-time prep (fold normalization into W/b, pad, cast) -- hoisted.
    w_pad, b_pad = prepare_net_params(mean_c, std_c, w, b, hw=H * W)
    w_pad, b_pad = jax.block_until_ready((w_pad, b_pad))

    labels = net_forward(x, w_pad, b_pad, num_classes=NUM_CLASSES)
    labels = jax.block_until_ready(labels)

    # Reference in plain f32 JAX. Tolerance loosened because x/W' are streamed
    # in bf16 (f32 MXU accumulation keeps the error ~1e-3 at these shapes).
    ref_norm = (x - mean_c.reshape(1, C, 1, 1)) / std_c.reshape(1, C, 1, 1)
    ref_labels = ref_norm.reshape(N, -1) @ w + b
    assert labels.shape == (N, NUM_CLASSES)
    assert jnp.allclose(labels, ref_labels, atol=3e-2, rtol=3e-2), (
        float(jnp.max(jnp.abs(labels - ref_labels)))
    )

    print("KERNEL_OK")
</pallas_src>

<mosaic_0001>
module attributes {stable_mosaic.version = 11 : i64} {
  func.func @_linear_kernel(%arg0: i32, %arg1: memref<2x768xbf16, #tpu.memory_space<vmem>>, %arg2: memref<768x128xbf16, #tpu.memory_space<vmem>>, %arg3: memref<1x128xf32, #tpu.memory_space<vmem>>, %arg4: memref<2x128xf32, #tpu.memory_space<vmem>>) attributes {dimension_semantics = [#tpu.dimension_semantics<parallel>], iteration_bounds = array<i64: 1>, scalar_prefetch = 0 : i64, scratch_operands = 0 : i64, tpu.core_type = #tpu.core_type<tc>, window_params = [{transform_indices = @transform_0, window_bounds = array<i64: 2, 768>}, {pipeline_mode = #tpu.pipeline_mode<synchronous>, transform_indices = @transform_1, window_bounds = array<i64: 768, 128>}, {pipeline_mode = #tpu.pipeline_mode<synchronous>, transform_indices = @transform_2, window_bounds = array<i64: 1, 128>}, {transform_indices = @transform_3, window_bounds = array<i64: 2, 128>}]} {
    %c0 = arith.constant 0 : index
    %c0_0 = arith.constant 0 : index
    %0 = vector.load %arg1[%c0, %c0_0] : memref<2x768xbf16, #tpu.memory_space<vmem>>, vector<2x768xbf16>
    %c0_1 = arith.constant 0 : index
    %c0_2 = arith.constant 0 : index
    %1 = vector.load %arg2[%c0_1, %c0_2] : memref<768x128xbf16, #tpu.memory_space<vmem>>, vector<768x128xbf16>
    %cst = arith.constant dense<0.000000e+00> : vector<2x128xf32>
    %2 = tpu.matmul %0, %1, %cst {dimension_numbers = #tpu.dot_dimension_numbers<[1], [0], [0], [1], [0, 0, 1, 1], [], []>} : vector<2x768xbf16>, vector<768x128xbf16>, vector<2x128xf32> -> vector<2x128xf32>
    %c0_3 = arith.constant 0 : index
    %c0_4 = arith.constant 0 : index
    %3 = vector.load %arg3[%c0_3, %c0_4] : memref<1x128xf32, #tpu.memory_space<vmem>>, vector<1x128xf32>
    %4 = vector.broadcast %3 : vector<1x128xf32> to vector<2x128xf32>
    %5 = arith.addf %2, %4 : vector<2x128xf32>
    %c0_5 = arith.constant 0 : index
    %c0_6 = arith.constant 0 : index
    %6 = vector.load %arg4[%c0_5, %c0_6] : memref<2x128xf32, #tpu.memory_space<vmem>>, vector<2x128xf32>
    tpu.vector_store %arg4[%c0_5, %c0_6], %5 {strides = array<i32>} : memref<2x128xf32, #tpu.memory_space<vmem>>, vector<2x128xf32>,
    return
  }
  func.func @transform_0(%arg0: i32) -> (i32, i32) {
    %c0_i32 = arith.constant 0 : i32
    %c0_i32_0 = arith.constant 0 : i32
    return %arg0, %c0_i32 : i32, i32
  }
  func.func @transform_1(%arg0: i32) -> (i32, i32) {
    %c0_i32 = arith.constant 0 : i32
    %c0_i32_0 = arith.constant 0 : i32
    %c0_i32_1 = arith.constant 0 : i32
    return %c0_i32, %c0_i32_0 : i32, i32
  }
  func.func @transform_2(%arg0: i32) -> (i32, i32) {
    %c0_i32 = arith.constant 0 : i32
    %c0_i32_0 = arith.constant 0 : i32
    %c0_i32_1 = arith.constant 0 : i32
    return %c0_i32, %c0_i32_0 : i32, i32
  }
  func.func @transform_3(%arg0: i32) -> (i32, i32) {
    %c0_i32 = arith.constant 0 : i32
    %c0_i32_0 = arith.constant 0 : i32
    return %arg0, %c0_i32 : i32, i32
  }
}

module attributes {stable_mosaic.version = 11 : i64} {
  func.func @_linear_kernel(%arg0: i32, %arg1: memref<2x768xbf16, #tpu.memory_space<vmem>>, %arg2: memref<768x128xbf16, #tpu.memory_space<vmem>>, %arg3: memref<1x128xf32, #tpu.memory_space<vmem>>, %arg4: memref<2x128xf32, #tpu.memory_space<vmem>>) attributes {dimension_semantics = [#tpu.dimension_semantics<parallel>], iteration_bounds = array<i64: 1>, scalar_prefetch = 0 : i64, scratch_operands = 0 : i64, tpu.core_type = #tpu.core_type<tc>, window_params = [{transform_indices = @transform_0, window_bounds = array<i64: 2, 768>}, {pipeline_mode = #tpu.pipeline_mode<synchronous>, transform_indices = @transform_1, window_bounds = array<i64: 768, 128>}, {pipeline_mode = #tpu.pipeline_mode<synchronous>, transform_indices = @transform_2, window_bounds = array<i64: 1, 128>}, {transform_indices = @transform_3, window_bounds = array<i64: 2, 128>}]} {
    %c0 = arith.constant 0 : index
    %c0_0 = arith.constant 0 : index
    %0 = vector.load %arg1[%c0, %c0_0] : memref<2x768xbf16, #tpu.memory_space<vmem>>, vector<2x768xbf16>
    %c0_1 = arith.constant 0 : index
    %c0_2 = arith.constant 0 : index
    %1 = vector.load %arg2[%c0_1, %c0_2] : memref<768x128xbf16, #tpu.memory_space<vmem>>, vector<768x128xbf16>
    %cst = arith.constant dense<0.000000e+00> : vector<2x128xf32>
    %2 = tpu.matmul %0, %1, %cst {dimension_numbers = #tpu.dot_dimension_numbers<[1], [0], [0], [1], [0, 0, 1, 1], [], []>} : vector<2x768xbf16>, vector<768x128xbf16>, vector<2x128xf32> -> vector<2x128xf32>
    %c0_3 = arith.constant 0 : index
    %c0_4 = arith.constant 0 : index
    %3 = vector.load %arg3[%c0_3, %c0_4] : memref<1x128xf32, #tpu.memory_space<vmem>>, vector<1x128xf32>
    %4 = vector.broadcast %3 : vector<1x128xf32> to vector<2x128xf32>
    %5 = arith.addf %2, %4 : vector<2x128xf32>
    %c0_5 = arith.constant 0 : index
    %c0_6 = arith.constant 0 : index
    %6 = vector.load %arg4[%c0_5, %c0_6] : memref<2x128xf32, #tpu.memory_space<vmem>>, vector<2x128xf32>
    tpu.vector_store %arg4[%c0_5, %c0_6], %5 {strides = array<i32>} : memref<2x128xf32, #tpu.memory_space<vmem>>, vector<2x128xf32>,
    return
  }
  func.func @transform_0(%arg0: i32) -> (i32, i32) {
    %c0_i32 = arith.constant 0 : i32
    %c0_i32_0 = arith.constant 0 : i32
    return %arg0, %c0_i32 : i32, i32
  }
  func.func @transform_1(%arg0: i32) -> (i32, i32) {
    %c0_i32 = arith.constant 0 : i32
    %c0_i32_0 = arith.constant 0 : i32
    %c0_i32_1 = arith.constant 0 : i32
    return %c0_i32, %c0_i32_0 : i32, i32
  }
  func.func @transform_2(%arg0: i32) -> (i32, i32) {
    %c0_i32 = arith.constant 0 : i32
    %c0_i32_0 = arith.constant 0 : i32
    %c0_i32_1 = arith.constant 0 : i32
    return %c0_i32, %c0_i32_0 : i32, i32
  }
  func.func @transform_3(%arg0: i32) -> (i32, i32) {
    %c0_i32 = arith.constant 0 : i32
    %c0_i32_0 = arith.constant 0 : i32
    return %arg0, %c0_i32 : i32, i32
  }
}

</mosaic_0001>

<bundles_post_ra>
// kernel: tpu_custom_call.1
= control target key start
LH: loop header
LB: loop body
LE: loop exit
PB: predicated region body
PF: predicated region fallthrough
CT: control target
= control target key end

     0   :  { %8 = vsyncpa [#allocation3], 0  ;;  %s899_s0 = inlined_call_operand.hbm [shape: bf16[2,768], index: 0, kind: input, shape index: {}]   ;;  %s900_s1 = inlined_call_operand.hbm [shape: bf16[768,128], index: 1, kind: input, shape index: {}]   ;;  %s901_s2 = inlined_call_operand.vmem [shape: f32[1,128], index: 2, kind: input, shape index: {}]   ;;  %s902_s3 = inlined_call_operand.hbm [shape: f32[2,128], index: 3, kind: output, shape index: {}]  }
   0x1   :  { %9 = vsyncpa [#allocation6], 0 }
   0x2   :  { %10 = vsyncpa [#allocation4], 0  ;;  %s861_s12 = smov [#allocation2]   ;;  %s862_s14 = smov [#allocation5]  }
   0x3   :  { %s17_s13 = sshll.u32 %s861_s12, 4  ;;  %s26_s15 = sshll.u32 %s862_s14, 4  ;;  %s18_s13 = int_to_ptr.vmem [resolvable:$true] %s17_s13  ;;  %s27_s15 = int_to_ptr.vmem [resolvable:$true] %s26_s15 }
   0x4   :  { %s803_s16 = scalar_lea.vmem %s18_s13, 96  ;;  %p808_p1 = scmp.lt.s32.totalorder %s18_s13, %s18_s13 }
   0x5   :  { %p804_p0 = scmp.ne.s32.totalorder %s18_s13, %s803_s16  ;;  %p809_p2 = scmp.lt.s32.totalorder %s803_s16, %s803_s16 }
   0x7   :  { %p810_p3 = por %p809_p2, %p808_p1 }
   0x9   :  { %p811_p4 = pnand %p810_p3, %p804_p0 }
   0xb   :  { %814 = shalt.err (!%p811_p4)
}
   0xc   :  { %20 = dma.hbm_to_vmem [thread:$0]  %s899_s0, 96, %s18_s13, [#allocation3]  }
   0xd   :  { %s823_s19 = scalar_lea.vmem %s27_s15, 6144  ;;  %p828_p6 = scmp.lt.s32.totalorder %s27_s15, %s27_s15 }
   0xe   :  { %p824_p5 = scmp.ne.s32.totalorder %s27_s15, %s823_s19  ;;  %p829_p7 = scmp.lt.s32.totalorder %s823_s19, %s823_s19 }
  0x10   :  { %p830_p8 = por %p829_p7, %p828_p6 }
  0x12   :  { %p831_p9 = pnand %p830_p8, %p824_p5 }
  0x14   :  { %834 = shalt.err (!%p831_p9)
}
  0x15   :  { %s863_s20 = smov 64   ;;  %s864_s21 = smov 4  }
  0x16   :  { %32 = dma.hbm_to_vmem [thread:$0]  %s900_s1, 6144, %s27_s15, [#allocation6], %s863_s20, %s863_s20, %s864_s21  }
  0x17   :  { %855 = dma.done.wait [#allocation3], 96  }
  0x18   :  { %856 = vsyncadd [#allocation3], 4294967200 }
  0x19   :  { %857 = dma.done.wait [#allocation6], 6144  }
  0x1a   :  { %858 = vsyncadd [#allocation6], 4294961152  ;;  %v746_v0 = vld [vmem:[#allocation5 + $0x78] sm:$0xff]   ;;  %v750_v4 = vld [vmem:[#allocation5 + $0x70] sm:$0xff]   ;;  %v865_v21 = vmov 1966171168   ;;  %v151_v23 = vlaneseq }
  0x1b   :  { %v747_v1 = vld [vmem:[#allocation5 + $0x38] sm:$0xff]   ;;  %674 = vmatprep.subr.bf16.mxu0 %v746_v0  ;;  %v751_v5 = vld [vmem:[#allocation5 + $0x30] sm:$0xff]   ;;  %v754_v8 = vld [vmem:[#allocation5 + $0x68] sm:$0xff]   ;;  %v149_v22 = vunpack.c.l.s4 %v865_v21  ;;  %s866_s24 = smov [#allocation7]  }
  0x1c   :  { %v748_v2 = vld [vmem:[#allocation5 + $0xf8] sm:$0xff]   ;;  %675 = vmatpush3.bf16.msra.mxu0 %v747_v1  ;;  %v752_v6 = vld [vmem:[#allocation5 + $0xf0] sm:$0xff]   ;;  %v755_v9 = vld [vmem:[#allocation5 + $0x28] sm:$0xff]   ;;  %v152_v29 = vshrl.u32 %v151_v23, 7  ;;  %s615_s25 = sshll.u32 %s866_s24, 4  ;;  %s616_s25 = int_to_ptr.vmem [resolvable:$true] %s615_s25 }
  0x1d   :  { %v749_v3 = vld [vmem:[#allocation5 + $0xb8] sm:$0xff]   ;;  %696 = vmatprep.subr.bf16.mxu1 %v748_v2  ;;  %676 = vmatprep.subr.bf16.mxu0 %v750_v4  ;;  %v753_v7 = vld [vmem:[#allocation5 + $0xb0] sm:$0xff]   ;;  %v756_v10 = vld [vmem:[#allocation5 + $0xe8] sm:$0xff]   ;;  %v150_v28 = vunpack.c.0.s8 %v149_v22  ;;  %s835_s26 = scalar_lea.vmem %s616_s25, 32  ;;  %p840_p11 = scmp.lt.s32.totalorder %s616_s25, %s616_s25 }
  0x1e   :  { %697 = vmatpush3.bf16.msra.mxu1 %v749_v3  ;;  %v757_v11 = vld [vmem:[#allocation5 + $0xa8] sm:$0xff]   ;;  %v758_v12 = vld [vmem:[#allocation5 + $0x60] sm:$0xff]   ;;  %v762_v16 = vld [vmem:[#allocation5 + $0x58] sm:$0xff]   ;;  %p836_p10 = scmp.ne.s32.totalorder %s616_s25, %s835_s26  ;;  %p841_p12 = scmp.lt.s32.totalorder %s835_s26, %s835_s26 }
  0x1f   :  { %698 = vmatprep.subr.bf16.mxu1 %v752_v6  ;;  %v759_v13 = vld [vmem:[#allocation5 + $0x20] sm:$0xff]   ;;  %v763_v17 = vld [vmem:[#allocation5 + $0x18] sm:$0xff]   ;;  %v766_v20 = vld [vmem:[#allocation5 + $0x50] sm:$0xff]   ;;  %v153_v34 = vsub.s32 %v150_v28, %v152_v29 }
  0x20   :  { %677 = vmatpush3.bf16.msra.mxu0 %v751_v5  ;;  %v760_v14 = vld [vmem:[#allocation5 + $0xe0] sm:$0xff]   ;;  %v764_v18 = vld [vmem:[#allocation5 + $0xd8] sm:$0xff]   ;;  %v767_v24 = vld [vmem:[#allocation5 + $0x10] sm:$0xff]   ;;  %p842_p13 = por %p841_p12, %p840_p11 }
  0x21   :  { %678 = vmatprep.subr.bf16.mxu0 %v754_v8  ;;  %v761_v15 = vld [vmem:[#allocation5 + $0xa0] sm:$0xff]   ;;  %v765_v19 = vld [vmem:[#allocation5 + $0x98] sm:$0xff]   ;;  %v768_v25 = vld [vmem:[#allocation5 + $0xd0] sm:$0xff]  }
  0x22   :  { %699 = vmatpush3.bf16.msra.mxu1 %v753_v7  ;;  %v769_v26 = vld [vmem:[#allocation5 + $0x90] sm:$0xff]   ;;  %v770_v27 = vld [vmem:[#allocation5 + $0x48] sm:$0xff]   ;;  %v774_v33 = vld [vmem:[#allocation5 + $0x40] sm:$0xff]   ;;  %p843_p0 = pnand %p842_p13, %p836_p10 }
  0x23   :  { %700 = vmatprep.subr.bf16.mxu1 %v756_v10  ;;  %v771_v30 = vld [vmem:[#allocation5 + $0x8] sm:$0xff]   ;;  %v775_v35 = vld [vmem:[#allocation5] sm:$0xff]   ;;  %v42_v37 = vld [vmem:[#allocation2] sm:$0x3f] }
  0x24   :  { %679 = vmatpush3.bf16.msra.mxu0 %v755_v9  ;;  %v772_v31 = vld [vmem:[#allocation5 + $0xc8] sm:$0xff]   ;;  %v776_v36 = vld [vmem:[#allocation5 + $0xc0] sm:$0xff]   ;;  %v147_v38 = vcombine.high %v42_v37, %v42_v37  ;;  %v154_v39 = vrot.slane %v42_v37, %v153_v34  ;;  %v779_v41 = vld [vmem:[#allocation5 + $0x178] sm:$0xff]  }
  0x25   :  { %680 = vmatprep.subr.bf16.mxu0 %v758_v12  ;;  %v773_v32 = vld [vmem:[#allocation5 + $0x88] sm:$0xff]   ;;  %v778_v40 = vld [vmem:[#allocation5 + $0x80] sm:$0xff]   ;;  %v780_v46 = vld [vmem:[#allocation5 + $0x138] sm:$0xff]  }
  0x26   :  { %701 = vmatpush3.bf16.msra.mxu1 %v757_v11  ;;  %v162_v42 = vcombine.high %v154_v39, %v154_v39  ;;  %v170_v43 = vrot.slane %v154_v39, %v153_v34  ;;  %v161_v44 = vrot.slane %v147_v38, %v153_v34  ;;  %v781_v49 = vld [vmem:[#allocation5 + $0x170] sm:$0xff]   ;;  %v783_v53 = vld [vmem:[#allocation5 + $0x168] sm:$0xff]   ;;  %v785_v55 = vld [vmem:[#allocation5 + $0x160] sm:$0xff]  }
  0x27   :  { %702 = vmatprep.subr.bf16.mxu1 %v760_v14  ;;  %v782_v52 = vld [vmem:[#allocation5 + $0x130] sm:$0xff]   ;;  %v784_v54 = vld [vmem:[#allocation5 + $0x128] sm:$0xff]   ;;  %v786_v56 = vld [vmem:[#allocation5 + $0x120] sm:$0xff]  }
  0x28   :  { %681 = vmatpush3.bf16.msra.mxu0 %v759_v13  ;;  %v184_v45 = vrot.slane %v162_v42, %v153_v34  ;;  %v163_v47 = vcombine.high %v161_v44, %v161_v44  ;;  %v192_v48 = vcombine.high %v170_v43, %v170_v43  ;;  %v787_v57 = vld [vmem:[#allocation5 + $0x158] sm:$0xff]   ;;  %v789_v59 = vld [vmem:[#allocation5 + $0x150] sm:$0xff]   ;;  %v791_v61 = vld [vmem:[#allocation5 + $0x148] sm:$0xff]   ;;  %v177_v1 = vrot.slane %v161_v44, %v153_v34 }
  0x29   :  { %682 = vmatprep.subr.bf16.mxu0 %v762_v16  ;;  %v788_v58 = vld [vmem:[#allocation5 + $0x118] sm:$0xff]   ;;  %v790_v60 = vld [vmem:[#allocation5 + $0x110] sm:$0xff]   ;;  %v792_v62 = vld [vmem:[#allocation5 + $0x108] sm:$0xff]  }
  0x2a   :  { %703 = vmatpush3.bf16.msra.mxu1 %v761_v15  ;;  %520 = vmatprep.mubr.bf16.mxu0 %v184_v45  ;;  %v193_v50 = vcombine.high %v184_v45, %v184_v45  ;;  %v191_v51 = vrot.slane %v163_v47, %v153_v34  ;;  %v793_v63 = vld [vmem:[#allocation5 + $0x140] sm:$0xff]   ;;  %v625_v11 = vld [vmem:[%s901_s2] ss:$0 sm:$0xff] }
  0x2b   :  { %704 = vmatprep.subr.bf16.mxu1 %v764_v18  ;;  %v794_v0 = vld [vmem:[#allocation5 + $0x100] sm:$0xff]  }
  0x2c   :  { %683 = vmatpush3.bf16.msra.mxu0 %v763_v17  ;;  %560 = vmatprep.mubr.bf16.mxu1 %v193_v50 }
  0x2d   :  { %684 = vmatprep.subr.bf16.mxu0 %v766_v20 }
  0x2e   :  { %705 = vmatpush3.bf16.msra.mxu1 %v765_v19 }
  0x2f   :  { %706 = vmatprep.subr.bf16.mxu1 %v768_v25 }
  0x30   :  { %685 = vmatpush3.bf16.msra.mxu0 %v767_v24 }
  0x31   :  { %686 = vmatprep.subr.bf16.mxu0 %v770_v27 }
  0x32   :  { %707 = vmatpush3.bf16.msra.mxu1 %v769_v26 }
  0x33   :  { %708 = vmatprep.subr.bf16.mxu1 %v772_v31 }
  0x34   :  { %687 = vmatpush3.bf16.msra.mxu0 %v771_v30 }
  0x35   :  { %688 = vmatprep.subr.bf16.mxu0 %v774_v33 }
  0x36   :  { %709 = vmatpush3.bf16.msra.mxu1 %v773_v32 }
  0x37   :  { %710 = vmatprep.subr.bf16.mxu1 %v776_v36 }
  0x38   :  { %689 = vmatpush3.bf16.msra.mxu0 %v775_v35 }
  0x39   :  { %718 = vmatprep.subr.bf16.mxu0 %v779_v41 }
  0x3a   :  { %711 = vmatpush3.bf16.msra.mxu1 %v778_v40 }
  0x3b   :  { %521 = vmatmul.mubr.bf16.vlgmr.msra.gmra.mxu0 %v170_v43 }
  0x3c   :  { %719 = vmatpush3.bf16.msra.mxu0 %v780_v46  ;;  %600 = vmatprep.mubr.bf16.mxu0 %v191_v51 }
  0x3d   :  { %561 = vmatmul.mubr.bf16.vlgmr.msra.gmra.mxu1 %v192_v48  ;;  %720 = vmatprep.subr.bf16.mxu0 %v781_v49 }
  0x40   :  { %721 = vmatpush3.bf16.msra.mxu0 %v782_v52 }
  0x41   :  { %722 = vmatprep.subr.bf16.mxu0 %v783_v53 }
  0x44   :  { %723 = vmatpush3.bf16.msra.mxu0 %v784_v54 }
  0x45   :  { %724 = vmatprep.subr.bf16.mxu0 %v785_v55 }
  0x48   :  { %725 = vmatpush3.bf16.msra.mxu0 %v786_v56 }
  0x49   :  { %726 = vmatprep.subr.bf16.mxu0 %v787_v57 }
  0x4c   :  { %727 = vmatpush3.bf16.msra.mxu0 %v788_v58 }
  0x4d   :  { %728 = vmatprep.subr.bf16.mxu0 %v789_v59 }
  0x50   :  { %729 = vmatpush3.bf16.msra.mxu0 %v790_v60 }
  0x51   :  { %730 = vmatprep.subr.bf16.mxu0 %v791_v61 }
  0x54   :  { %731 = vmatpush3.bf16.msra.mxu0 %v792_v62 }
  0x55   :  { %732 = vmatprep.subr.bf16.mxu0 %v793_v63 }
  0x58   :  { %733 = vmatpush3.bf16.msra.mxu0 %v794_v0 }
  0x5b   :  { %601 = vmatmul.mubr.bf16.vlgmr.msra.gmra.mxu0 %v177_v1 }
  0xfb   :  { %v690_v2 = vpop.f32.mrf.mxu0 }
  0xfd   :  { %v691_v3 = vpop.f32.mrf.mxu0  ;;  %v712_v4 = vpop.f32.mrf.mxu1 }
  0xfe   :  { %v692_v10 = vadd.f32 %v691_v3, %v690_v2 }
  0xff   :  { %v693_v5 = vpop.f32.mrf.mxu0  ;;  %v713_v6 = vpop.f32.mrf.mxu1 }
 0x100   :  { %v523_v12 = vadd.f32 %v692_v10, %v625_v11  ;;  %v714_v13 = vadd.f32 %v713_v6, %v712_v4 }
 0x101   :  { %v694_v7 = vpop.f32.mrf.mxu0  ;;  %v715_v8 = vpop.f32.mrf.mxu1 }
 0x102   :  { %v563_v16 = vadd.f32 %v714_v13, %v523_v12 }
 0x103   :  { %v716_v9 = vpop.f32.mrf.mxu1 }
 0x11b   :  { %v734_v14 = vpop.f32.mrf.mxu0 }
 0x11d   :  { %v735_v15 = vpop.f32.mrf.mxu0 }
 0x11e   :  { %v736_v17 = vadd.f32 %v735_v15, %v734_v14 }
 0x11f   :  { %v737_v18 = vpop.f32.mrf.mxu0 }
 0x120   :  { %v603_v19 = vadd.f32 %v736_v17, %v563_v16 }
 0x121   :  { %v738_v20 = vpop.f32.mrf.mxu0 }
 0x122   :  { %608 = vst [vmem:[#allocation7] sm:$0x3] %v603_v19 }
 0x123   :  { %846 = shalt.err (!%p843_p0)
}
 0x124   :  { %618 = dma.vmem_to_hbm [thread:$0]  %s616_s25, 32, %s902_s3, [#allocation4]  }
 0x125   :  { %859 = dma.done.wait [#allocation4], 32  }
 0x126   :  { %860 = vsyncadd [#allocation4], 4294967264 }
 0x127   :  { %622 = vsyncpa [#allocation3], 1 }
 0x128   :  { %623 = vsyncpa [#allocation6], 1 }
 0x129   :  { %624 = vsyncpa [#allocation4], 1 }

// kernel: tpu_custom_call.1
= control target key start
LH: loop header
LB: loop body
LE: loop exit
PB: predicated region body
PF: predicated region fallthrough
CT: control target
= control target key end

     0   :  { %8 = vsyncpa [#allocation3], 0  ;;  %s899_s0 = inlined_call_operand.hbm [shape: bf16[2,768], index: 0, kind: input, shape index: {}]   ;;  %s900_s1 = inlined_call_operand.hbm [shape: bf16[768,128], index: 1, kind: input, shape index: {}]   ;;  %s901_s2 = inlined_call_operand.vmem [shape: f32[1,128], index: 2, kind: input, shape index: {}]   ;;  %s902_s3 = inlined_call_operand.hbm [shape: f32[2,128], index: 3, kind: output, shape index: {}]  }
   0x1   :  { %9 = vsyncpa [#allocation6], 0 }
   0x2   :  { %10 = vsyncpa [#allocation4], 0  ;;  %s861_s12 = smov [#allocation2]   ;;  %s862_s14 = smov [#allocation5]  }
   0x3   :  { %s17_s13 = sshll.u32 %s861_s12, 4  ;;  %s26_s15 = sshll.u32 %s862_s14, 4  ;;  %s18_s13 = int_to_ptr.vmem [resolvable:$true] %s17_s13  ;;  %s27_s15 = int_to_ptr.vmem [resolvable:$true] %s26_s15 }
   0x4   :  { %s803_s16 = scalar_lea.vmem %s18_s13, 96  ;;  %p808_p1 = scmp.lt.s32.totalorder %s18_s13, %s18_s13 }
   0x5   :  { %p804_p0 = scmp.ne.s32.totalorder %s18_s13, %s803_s16  ;;  %p809_p2 = scmp.lt.s32.totalorder %s803_s16, %s803_s16 }
   0x7   :  { %p810_p3 = por %p809_p2, %p808_p1 }
   0x9   :  { %p811_p4 = pnand %p810_p3, %p804_p0 }
   0xb   :  { %814 = shalt.err (!%p811_p4)
}
   0xc   :  { %20 = dma.hbm_to_vmem [thread:$0]  %s899_s0, 96, %s18_s13, [#allocation3]  }
   0xd   :  { %s823_s19 = scalar_lea.vmem %s27_s15, 6144  ;;  %p828_p6 = scmp.lt.s32.totalorder %s27_s15, %s27_s15 }
   0xe   :  { %p824_p5 = scmp.ne.s32.totalorder %s27_s15, %s823_s19  ;;  %p829_p7 = scmp.lt.s32.totalorder %s823_s19, %s823_s19 }
  0x10   :  { %p830_p8 = por %p829_p7, %p828_p6 }
  0x12   :  { %p831_p9 = pnand %p830_p8, %p824_p5 }
  0x14   :  { %834 = shalt.err (!%p831_p9)
}
  0x15   :  { %s863_s20 = smov 64   ;;  %s864_s21 = smov 4  }
  0x16   :  { %32 = dma.hbm_to_vmem [thread:$0]  %s900_s1, 6144, %s27_s15, [#allocation6], %s863_s20, %s863_s20, %s864_s21  }
  0x17   :  { %855 = dma.done.wait [#allocation3], 96  }
  0x18   :  { %856 = vsyncadd [#allocation3], 4294967200 }
  0x19   :  { %857 = dma.done.wait [#allocation6], 6144  }
  0x1a   :  { %858 = vsyncadd [#allocation6], 4294961152  ;;  %v746_v0 = vld [vmem:[#allocation5 + $0x78] sm:$0xff]   ;;  %v750_v4 = vld [vmem:[#allocation5 + $0x70] sm:$0xff]   ;;  %v865_v21 = vmov 1966171168   ;;  %v151_v23 = vlaneseq }
  0x1b   :  { %v747_v1 = vld [vmem:[#allocation5 + $0x38] sm:$0xff]   ;;  %674 = vmatprep.subr.bf16.mxu0 %v746_v0  ;;  %v751_v5 = vld [vmem:[#allocation5 + $0x30] sm:$0xff]   ;;  %v754_v8 = vld [vmem:[#allocation5 + $0x68] sm:$0xff]   ;;  %v149_v22 = vunpack.c.l.s4 %v865_v21  ;;  %s866_s24 = smov [#allocation7]  }
  0x1c   :  { %v748_v2 = vld [vmem:[#allocation5 + $0xf8] sm:$0xff]   ;;  %675 = vmatpush3.bf16.msra.mxu0 %v747_v1  ;;  %v752_v6 = vld [vmem:[#allocation5 + $0xf0] sm:$0xff]   ;;  %v755_v9 = vld [vmem:[#allocation5 + $0x28] sm:$0xff]   ;;  %v152_v29 = vshrl.u32 %v151_v23, 7  ;;  %s615_s25 = sshll.u32 %s866_s24, 4  ;;  %s616_s25 = int_to_ptr.vmem [resolvable:$true] %s615_s25 }
  0x1d   :  { %v749_v3 = vld [vmem:[#allocation5 + $0xb8] sm:$0xff]   ;;  %696 = vmatprep.subr.bf16.mxu1 %v748_v2  ;;  %676 = vmatprep.subr.bf16.mxu0 %v750_v4  ;;  %v753_v7 = vld [vmem:[#allocation5 + $0xb0] sm:$0xff]   ;;  %v756_v10 = vld [vmem:[#allocation5 + $0xe8] sm:$0xff]   ;;  %v150_v28 = vunpack.c.0.s8 %v149_v22  ;;  %s835_s26 = scalar_lea.vmem %s616_s25, 32  ;;  %p840_p11 = scmp.lt.s32.totalorder %s616_s25, %s616_s25 }
  0x1e   :  { %697 = vmatpush3.bf16.msra.mxu1 %v749_v3  ;;  %v757_v11 = vld [vmem:[#allocation5 + $0xa8] sm:$0xff]   ;;  %v758_v12 = vld [vmem:[#allocation5 + $0x60] sm:$0xff]   ;;  %v762_v16 = vld [vmem:[#allocation5 + $0x58] sm:$0xff]   ;;  %p836_p10 = scmp.ne.s32.totalorder %s616_s25, %s835_s26  ;;  %p841_p12 = scmp.lt.s32.totalorder %s835_s26, %s835_s26 }
  0x1f   :  { %698 = vmatprep.subr.bf16.mxu1 %v752_v6  ;;  %v759_v13 = vld [vmem:[#allocation5 + $0x20] sm:$0xff]   ;;  %v763_v17 = vld [vmem:[#allocation5 + $0x18] sm:$0xff]   ;;  %v766_v20 = vld [vmem:[#allocation5 + $0x50] sm:$0xff]   ;;  %v153_v34 = vsub.s32 %v150_v28, %v152_v29 }
  0x20   :  { %677 = vmatpush3.bf16.msra.mxu0 %v751_v5  ;;  %v760_v14 = vld [vmem:[#allocation5 + $0xe0] sm:$0xff]   ;;  %v764_v18 = vld [vmem:[#allocation5 + $0xd8] sm:$0xff]   ;;  %v767_v24 = vld [vmem:[#allocation5 + $0x10] sm:$0xff]   ;;  %p842_p13 = por %p841_p12, %p840_p11 }
  0x21   :  { %678 = vmatprep.subr.bf16.mxu0 %v754_v8  ;;  %v761_v15 = vld [vmem:[#allocation5 + $0xa0] sm:$0xff]   ;;  %v765_v19 = vld [vmem:[#allocation5 + $0x98] sm:$0xff]   ;;  %v768_v25 = vld [vmem:[#allocation5 + $0xd0] sm:$0xff]  }
  0x22   :  { %699 = vmatpush3.bf16.msra.mxu1 %v753_v7  ;;  %v769_v26 = vld [vmem:[#allocation5 + $0x90] sm:$0xff]   ;;  %v770_v27 = vld [vmem:[#allocation5 + $0x48] sm:$0xff]   ;;  %v774_v33 = vld [vmem:[#allocation5 + $0x40] sm:$0xff]   ;;  %p843_p0 = pnand %p842_p13, %p836_p10 }
  0x23   :  { %700 = vmatprep.subr.bf16.mxu1 %v756_v10  ;;  %v771_v30 = vld [vmem:[#allocation5 + $0x8] sm:$0xff]   ;;  %v775_v35 = vld [vmem:[#allocation5] sm:$0xff]   ;;  %v42_v37 = vld [vmem:[#allocation2] sm:$0x3f] }
  0x24   :  { %679 = vmatpush3.bf16.msra.mxu0 %v755_v9  ;;  %v772_v31 = vld [vmem:[#allocation5 + $0xc8] sm:$0xff]   ;;  %v776_v36 = vld [vmem:[#allocation5 + $0xc0] sm:$0xff]   ;;  %v147_v38 = vcombine.high %v42_v37, %v42_v37  ;;  %v154_v39 = vrot.slane %v42_v37, %v153_v34  ;;  %v779_v41 = vld [vmem:[#allocation5 + $0x178] sm:$0xff]  }
  0x25   :  { %680 = vmatprep.subr.bf16.mxu0 %v758_v12  ;;  %v773_v32 = vld [vmem:[#allocation5 + $0x88] sm:$0xff]   ;;  %v778_v40 = vld [vmem:[#allocation5 + $0x80] sm:$0xff]   ;;  %v780_v46 = vld [vmem:[#allocation5 + $0x138] sm:$0xff]  }
  0x26   :  { %701 = vmatpush3.bf16.msra.mxu1 %v757_v11  ;;  %v162_v42 = vcombine.high %v154_v39, %v154_v39  ;;  %v170_v43 = vrot.slane %v154_v39, %v153_v34  ;;  %v161_v44 = vrot.slane %v147_v38, %v153_v34  ;;  %v781_v49 = vld [vmem:[#allocation5 + $0x170] sm:$0xff]   ;;  %v783_v53 = vld [vmem:[#allocation5 + $0x168] sm:$0xff]   ;;  %v785_v55 = vld [vmem:[#allocation5 + $0x160] sm:$0xff]  }
  0x27   :  { %702 = vmatprep.subr.bf16.mxu1 %v760_v14  ;;  %v782_v52 = vld [vmem:[#allocation5 + $0x130] sm:$0xff]   ;;  %v784_v54 = vld [vmem:[#allocation5 + $0x128] sm:$0xff]   ;;  %v786_v56 = vld [vmem:[#allocation5 + $0x120] sm:$0xff]  }
  0x28   :  { %681 = vmatpush3.bf16.msra.mxu0 %v759_v13  ;;  %v184_v45 = vrot.slane %v162_v42, %v153_v34  ;;  %v163_v47 = vcombine.high %v161_v44, %v161_v44  ;;  %v192_v48 = vcombine.high %v170_v43, %v170_v43  ;;  %v787_v57 = vld [vmem:[#allocation5 + $0x158] sm:$0xff]   ;;  %v789_v59 = vld [vmem:[#allocation5 + $0x150] sm:$0xff]   ;;  %v791_v61 = vld [vmem:[#allocation5 + $0x148] sm:$0xff]   ;;  %v177_v1 = vrot.slane %v161_v44, %v153_v34 }
  0x29   :  { %682 = vmatprep.subr.bf16.mxu0 %v762_v16  ;;  %v788_v58 = vld [vmem:[#allocation5 + $0x118] sm:$0xff]   ;;  %v790_v60 = vld [vmem:[#allocation5 + $0x110] sm:$0xff]   ;;  %v792_v62 = vld [vmem:[#allocation5 + $0x108] sm:$0xff]  }
  0x2a   :  { %703 = vmatpush3.bf16.msra.mxu1 %v761_v15  ;;  %520 = vmatprep.mubr.bf16.mxu0 %v184_v45  ;;  %v193_v50 = vcombine.high %v184_v45, %v184_v45  ;;  %v191_v51 = vrot.slane %v163_v47, %v153_v34  ;;  %v793_v63 = vld [vmem:[#allocation5 + $0x140] sm:$0xff]   ;;  %v625_v11 = vld [vmem:[%s901_s2] ss:$0 sm:$0xff] }
  0x2b   :  { %704 = vmatprep.subr.bf16.mxu1 %v764_v18  ;;  %v794_v0 = vld [vmem:[#allocation5 + $0x100] sm:$0xff]  }
  0x2c   :  { %683 = vmatpush3.bf16.msra.mxu0 %v763_v17  ;;  %560 = vmatprep.mubr.bf16.mxu1 %v193_v50 }
  0x2d   :  { %684 = vmatprep.subr.bf16.mxu0 %v766_v20 }
  0x2e   :  { %705 = vmatpush3.bf16.msra.mxu1 %v765_v19 }
  0x2f   :  { %706 = vmatprep.subr.bf16.mxu1 %v768_v25 }
  0x30   :  { %685 = vmatpush3.bf16.msra.mxu0 %v767_v24 }
  0x31   :  { %686 = vmatprep.subr.bf16.mxu0 %v770_v27 }
  0x32   :  { %707 = vmatpush3.bf16.msra.mxu1 %v769_v26 }
  0x33   :  { %708 = vmatprep.subr.bf16.mxu1 %v772_v31 }
  0x34   :  { %687 = vmatpush3.bf16.msra.mxu0 %v771_v30 }
  0x35   :  { %688 = vmatprep.subr.bf16.mxu0 %v774_v33 }
  0x36   :  { %709 = vmatpush3.bf16.msra.mxu1 %v773_v32 }
  0x37   :  { %710 = vmatprep.subr.bf16.mxu1 %v776_v36 }
  0x38   :  { %689 = vmatpush3.bf16.msra.mxu0 %v775_v35 }
  0x39   :  { %718 = vmatprep.subr.bf16.mxu0 %v779_v41 }
  0x3a   :  { %711 = vmatpush3.bf16.msra.mxu1 %v778_v40 }
  0x3b   :  { %521 = vmatmul.mubr.bf16.vlgmr.msra.gmra.mxu0 %v170_v43 }
  0x3c   :  { %719 = vmatpush3.bf16.msra.mxu0 %v780_v46  ;;  %600 = vmatprep.mubr.bf16.mxu0 %v191_v51 }
  0x3d   :  { %561 = vmatmul.mubr.bf16.vlgmr.msra.gmra.mxu1 %v192_v48  ;;  %720 = vmatprep.subr.bf16.mxu0 %v781_v49 }
  0x40   :  { %721 = vmatpush3.bf16.msra.mxu0 %v782_v52 }
  0x41   :  { %722 = vmatprep.subr.bf16.mxu0 %v783_v53 }
  0x44   :  { %723 = vmatpush3.bf16.msra.mxu0 %v784_v54 }
  0x45   :  { %724 = vmatprep.subr.bf16.mxu0 %v785_v55 }
  0x48   :  { %725 = vmatpush3.bf16.msra.mxu0 %v786_v56 }
  0x49   :  { %726 = vmatprep.subr.bf16.mxu0 %v787_v57 }
  0x4c   :  { %727 = vmatpush3.bf16.msra.mxu0 %v788_v58 }
  0x4d   :  { %728 = vmatprep.subr.bf16.mxu0 %v789_v59 }
  0x50   :  { %729 = vmatpush3.bf16.msra.mxu0 %v790_v60 }
  0x51   :  { %730 = vmatprep.subr.bf16.mxu0 %v791_v61 }
  0x54   :  { %731 = vmatpush3.bf16.msra.mxu0 %v792_v62 }
  0x55   :  { %732 = vmatprep.subr.bf16.mxu0 %v793_v63 }
  0x58   :  { %733 = vmatpush3.bf16.msra.mxu0 %v794_v0 }
  0x5b   :  { %601 = vmatmul.mubr.bf16.vlgmr.msra.gmra.mxu0 %v177_v1 }
  0xfb   :  { %v690_v2 = vpop.f32.mrf.mxu0 }
  0xfd   :  { %v691_v3 = vpop.f32.mrf.mxu0  ;;  %v712_v4 = vpop.f32.mrf.mxu1 }
  0xfe   :  { %v692_v10 = vadd.f32 %v691_v3, %v690_v2 }
  0xff   :  { %v693_v5 = vpop.f32.mrf.mxu0  ;;  %v713_v6 = vpop.f32.mrf.mxu1 }
 0x100   :  { %v523_v12 = vadd.f32 %v692_v10, %v625_v11  ;;  %v714_v13 = vadd.f32 %v713_v6, %v712_v4 }
 0x101   :  { %v694_v7 = vpop.f32.mrf.mxu0  ;;  %v715_v8 = vpop.f32.mrf.mxu1 }
 0x102   :  { %v563_v16 = vadd.f32 %v714_v13, %v523_v12 }
 0x103   :  { %v716_v9 = vpop.f32.mrf.mxu1 }
 0x11b   :  { %v734_v14 = vpop.f32.mrf.mxu0 }
 0x11d   :  { %v735_v15 = vpop.f32.mrf.mxu0 }
 0x11e   :  { %v736_v17 = vadd.f32 %v735_v15, %v734_v14 }
 0x11f   :  { %v737_v18 = vpop.f32.mrf.mxu0 }
 0x120   :  { %v603_v19 = vadd.f32 %v736_v17, %v563_v16 }
 0x121   :  { %v738_v20 = vpop.f32.mrf.mxu0 }
 0x122   :  { %608 = vst [vmem:[#allocation7] sm:$0x3] %v603_v19 }
 0x123   :  { %846 = shalt.err (!%p843_p0)
}
 0x124   :  { %618 = dma.vmem_to_hbm [thread:$0]  %s616_s25, 32, %s902_s3, [#allocation4]  }
 0x125   :  { %859 = dma.done.wait [#allocation4], 32  }
 0x126   :  { %860 = vsyncadd [#allocation4], 4294967264 }
 0x127   :  { %622 = vsyncpa [#allocation3], 1 }
 0x128   :  { %623 = vsyncpa [#allocation6], 1 }
 0x129   :  { %624 = vsyncpa [#allocation4], 1 }

</bundles_post_ra>
